<compile_context>
chip_gen: v7x
topology: tpu7x:2x2x1
jax: 0.10.0
libtpu: 0.0.40
codegen_flags: <defaults>
</compile_context>

<pallas_src>
import functools

import jax
import jax.numpy as jnp
from jax.experimental import pallas as pl
from jax.experimental.pallas import tpu as pltpu


def _round_up(v, m):
    return ((v + m - 1) // m) * m


def _critic_kernel(x_ref, a_ref,
                   w1x_ref, w1a_ref, b1_ref,
                   w2_ref, b2_ref,
                   w3_ref, b3_ref,
                   w4_ref, b4_ref,
                   q_ref, *, n_chunks, chunk):
    """One batch tile (tb rows) of the 4-layer MLP.

    Weights arrive pre-transposed to [in, out] so every matmul is the canonical
    jnp.dot(x, w) contraction (no per-step XLU transposes).  The tile is split into
    `n_chunks` independent row sub-chunks so the LLO scheduler can overlap one
    chunk's bias+ReLU+cast (VPU) with another chunk's GEMM (MXU).
    """
    # Hoisted loads: weights/biases are VMEM-resident (constant index maps).
    w1x = w1x_ref[...]
    w1a = w1a_ref[...]
    w2 = w2_ref[...]
    w3 = w3_ref[...]
    w4 = w4_ref[...]
    b1 = b1_ref[...]
    b2 = b2_ref[...]
    b3 = b3_ref[...]
    b4 = b4_ref[0, 0]

    for c in range(n_chunks):          # unrolled: independent chains -> MXU/VPU overlap
        r0 = c * chunk

        # In-kernel bf16 cast (spare VPU slots; avoids wrapper-side HBM read+write).
        xs = x_ref[pl.ds(r0, chunk), :].astype(jnp.bfloat16)
        ac = a_ref[pl.ds(r0, chunk), :].astype(jnp.bfloat16)

        # fc1: cat([x, a/max_a]) @ W1  ==  x @ W1x + a @ W1a   (W1a pre-scaled by 1/max_a)
        h = jnp.dot(xs, w1x, preferred_element_type=jnp.float32)
        h = h + jnp.dot(ac, w1a, preferred_element_type=jnp.float32)
        h = jnp.maximum(h + b1, 0.0).astype(jnp.bfloat16)

        # fc2 + relu
        h = jnp.dot(h, w2, preferred_element_type=jnp.float32)
        h = jnp.maximum(h + b2, 0.0).astype(jnp.bfloat16)

        # fc3 + relu
        h = jnp.dot(h, w3, preferred_element_type=jnp.float32)
        h = jnp.maximum(h + b3, 0.0).astype(jnp.bfloat16)

        # q_out: [chunk,256] @ [256,1] on the MXU (h is NOT transposed), f32 accumulate.
        # The [chunk,1] column writeback is only chunk*4 bytes; its stores hide under the
        # fc4 GEMM, so we skip the (chunk,1)->(1,chunk) relayout a lane-dense row would need.
        q = jnp.dot(h, w4, preferred_element_type=jnp.float32) + b4
        q_ref[pl.ds(r0, chunk), :] = q


def prepare_critic_params(params, max_action, x_dim):
    """One-time conversion of PyTorch-layout f32 params into kernel-ready arrays.

    * transposes every weight to [in, out] so the kernel uses canonical jnp.dot
      contractions (no per-step XLU transposes of 256x256 weights),
    * splits w1 into its x / action column blocks (fused concat),
    * folds 1/max_action into the action block,
    * casts matmul operands to bf16 (biases stay f32).
    Do this once, outside the training/inference hot path.
    """
    w1_t = jnp.transpose(params["w1"])                                # [in_dim, 256]
    return dict(
        w1x=w1_t[:x_dim, :].astype(jnp.bfloat16),                     # [x_dim, 256]
        w1a=(w1_t[x_dim:, :] / max_action).astype(jnp.bfloat16),      # [act_dim, 256]
        w2=jnp.transpose(params["w2"]).astype(jnp.bfloat16),          # [256, 256]
        w3=jnp.transpose(params["w3"]).astype(jnp.bfloat16),          # [256, 256]
        w4=jnp.transpose(params["w4"]).astype(jnp.bfloat16),          # [256, 1]
        b1=params["b1"].reshape(1, -1).astype(jnp.float32),
        b2=params["b2"].reshape(1, -1).astype(jnp.float32),
        b3=params["b3"].reshape(1, -1).astype(jnp.float32),
        b4=params["b4"].reshape(1, 1).astype(jnp.float32),
    )


@functools.partial(jax.jit, static_argnames=("batch_tile",))
def critic_forward(x, actions, kparams, *, batch_tile=2048):
    """x: [B, obs+goal] f32, actions: [B, action] f32. Returns q: [B, 1] f32."""
    B, dx = x.shape
    da = actions.shape[1]
    H = kparams["w2"].shape[1]  # 256

    assert batch_tile % 256 == 0, "batch_tile must be a multiple of 256"

    # Batch tile: big enough to amortize the ~0.35us/step grid overhead, but sized so
    # medium batches still yield >=2 grid steps (megacore on v7x), and capped near B for
    # tiny batches so we don't burn MXU cycles on padded rows.
    tb = min(batch_tile, max(256, _round_up(pl.cdiv(B, 2), 256)))
    tb = min(tb, _round_up(B, 8))
    grid = (pl.cdiv(B, tb),)
    n_out = grid[0] * tb

    # Two independent row sub-chunks per tile (when the tile is big enough) so the VPU
    # epilogue of one chunk overlaps the MXU GEMM of the other.
    n_chunks = 2 if tb >= 512 else 1
    chunk = tb // n_chunks

    def _const(shape):  # same block every grid step -> stays VMEM-resident, no re-DMA
        return pl.BlockSpec(shape, lambda i: (0, 0))

    in_specs = [
        pl.BlockSpec((tb, dx), lambda i: (i, 0)),            # x batch tile (f32, cast in-kernel)
        pl.BlockSpec((tb, da), lambda i: (i, 0)),            # action batch tile
        _const((dx, H)),                                      # w1x  [in, out]
        _const((da, H)),                                      # w1a  (pre-scaled)
        _const((1, H)),                                       # b1
        _const((H, H)),                                       # w2
        _const((1, H)),                                       # b2
        _const((H, H)),                                       # w3
        _const((1, H)),                                       # b3
        _const((H, 1)),                                       # w4   [256, 1]
        pl.BlockSpec(memory_space=pltpu.MemorySpace.SMEM),    # b4 scalar
    ]
    out_specs = pl.BlockSpec((tb, 1), lambda i: (i, 0))

    kernel = functools.partial(_critic_kernel, n_chunks=n_chunks, chunk=chunk)
    out = pl.pallas_call(
        kernel,
        out_shape=jax.ShapeDtypeStruct((n_out, 1), jnp.float32),
        grid=grid,
        in_specs=in_specs,
        out_specs=out_specs,
        compiler_params=pltpu.CompilerParams(
            dimension_semantics=("parallel",),   # batch tiles are independent -> megacore
        ),
    )(x, actions,
      kparams["w1x"], kparams["w1a"], kparams["b1"],
      kparams["w2"], kparams["b2"],
      kparams["w3"], kparams["b3"],
      kparams["w4"], kparams["b4"])

    return out[:B]   # drop padded rows of the last partial tile


def init_params(key, in_dim, hidden=256):
    """Deterministic init matching nn.Linear default: U(-1/sqrt(fan_in), 1/sqrt(fan_in))."""
    ks = jax.random.split(key, 8)

    def lin(kw, kb, fan_in, fan_out):
        bound = 1.0 / jnp.sqrt(fan_in)
        w = jax.random.uniform(kw, (fan_out, fan_in), jnp.float32, -bound, bound)
        b = jax.random.uniform(kb, (fan_out,), jnp.float32, -bound, bound)
        return w, b

    w1, b1 = lin(ks[0], ks[1], in_dim, hidden)
    w2, b2 = lin(ks[2], ks[3], hidden, hidden)
    w3, b3 = lin(ks[4], ks[5], hidden, hidden)
    w4, b4 = lin(ks[6], ks[7], hidden, 1)
    return dict(w1=w1, b1=b1, w2=w2, b2=b2, w3=w3, b3=b3, w4=w4, b4=b4)


def critic_reference(x, actions, params, max_action):
    """Pure-JAX f32 reference of the PyTorch forward pass."""
    h = jnp.concatenate([x, actions / max_action], axis=1)
    h = jax.nn.relu(h @ params["w1"].T + params["b1"])
    h = jax.nn.relu(h @ params["w2"].T + params["b2"])
    h = jax.nn.relu(h @ params["w3"].T + params["b3"])
    return h @ params["w4"].T + params["b4"]


if __name__ == "__main__":
    # env_params: obs=10, goal=3, action=4, max_action=1.0
    obs_dim, goal_dim, act_dim = 10, 3, 4
    max_action = 1.0
    x_dim = obs_dim + goal_dim      # 13
    in_dim = x_dim + act_dim        # 17

    key = jax.random.PRNGKey(0)
    k_x, k_a, k_p, k_x2, k_a2 = jax.random.split(key, 5)

    params = init_params(k_p, in_dim)
    kparams = prepare_critic_params(params, max_action, x_dim)

    # Small-batch check (single grid step, single sub-chunk, tiny padded tile).
    batch = 2
    x = jax.random.normal(k_x, (batch, x_dim), jnp.float32)
    actions = jax.random.uniform(k_a, (batch, act_dim), jnp.float32, -max_action, max_action)
    q = jax.block_until_ready(critic_forward(x, actions, kparams))
    q_ref = critic_reference(x, actions, params, max_action)
    assert q.shape == (batch, 1)
    assert jnp.allclose(q, q_ref, atol=5e-2, rtol=5e-2), (q, q_ref)

    # Medium batch exercising grid=2 (megacore split), 2 sub-chunks, and a partial last tile.
    batch2 = 600
    x2 = jax.random.normal(k_x2, (batch2, x_dim), jnp.float32)
    a2 = jax.random.uniform(k_a2, (batch2, act_dim), jnp.float32, -max_action, max_action)
    q2 = jax.block_until_ready(critic_forward(x2, a2, kparams))
    q2_ref = critic_reference(x2, a2, params, max_action)
    assert q2.shape == (batch2, 1)
    assert jnp.allclose(q2, q2_ref, atol=5e-2, rtol=5e-2)

    print("KERNEL_OK")
</pallas_src>

<mosaic_0001>
module attributes {stable_mosaic.version = 11 : i64} {
  func.func @_critic_kernel(%arg0: i32, %arg1: memref<8x13xf32, #tpu.memory_space<vmem>>, %arg2: memref<8x4xf32, #tpu.memory_space<vmem>>, %arg3: memref<13x256xbf16, #tpu.memory_space<vmem>>, %arg4: memref<4x256xbf16, #tpu.memory_space<vmem>>, %arg5: memref<1x256xf32, #tpu.memory_space<vmem>>, %arg6: memref<256x256xbf16, #tpu.memory_space<vmem>>, %arg7: memref<1x256xf32, #tpu.memory_space<vmem>>, %arg8: memref<256x256xbf16, #tpu.memory_space<vmem>>, %arg9: memref<1x256xf32, #tpu.memory_space<vmem>>, %arg10: memref<256x1xbf16, #tpu.memory_space<vmem>>, %arg11: memref<1x1xf32, #tpu.memory_space<smem>>, %arg12: memref<8x1xf32, #tpu.memory_space<vmem>>) attributes {dimension_semantics = [#tpu.dimension_semantics<parallel>], iteration_bounds = array<i64: 1>, scalar_prefetch = 0 : i64, scratch_operands = 0 : i64, tpu.core_type = #tpu.core_type<tc>, window_params = [{transform_indices = @transform_0, window_bounds = array<i64: 8, 13>}, {transform_indices = @transform_1, window_bounds = array<i64: 8, 4>}, {pipeline_mode = #tpu.pipeline_mode<synchronous>, transform_indices = @transform_2, window_bounds = array<i64: 13, 256>}, {pipeline_mode = #tpu.pipeline_mode<synchronous>, transform_indices = @transform_3, window_bounds = array<i64: 4, 256>}, {pipeline_mode = #tpu.pipeline_mode<synchronous>, transform_indices = @transform_4, window_bounds = array<i64: 1, 256>}, {pipeline_mode = #tpu.pipeline_mode<synchronous>, transform_indices = @transform_5, window_bounds = array<i64: 256, 256>}, {pipeline_mode = #tpu.pipeline_mode<synchronous>, transform_indices = @transform_6, window_bounds = array<i64: 1, 256>}, {pipeline_mode = #tpu.pipeline_mode<synchronous>, transform_indices = @transform_7, window_bounds = array<i64: 256, 256>}, {pipeline_mode = #tpu.pipeline_mode<synchronous>, transform_indices = @transform_8, window_bounds = array<i64: 1, 256>}, {pipeline_mode = #tpu.pipeline_mode<synchronous>, transform_indices = @transform_9, window_bounds = array<i64: 256, 1>}, {transform_indices = @transform_10, window_bounds = array<i64: 1, 1>}, {transform_indices = @transform_11, window_bounds = array<i64: 8, 1>}]} {
    %c0 = arith.constant 0 : index
    %c0_0 = arith.constant 0 : index
    %0 = vector.load %arg3[%c0, %c0_0] : memref<13x256xbf16, #tpu.memory_space<vmem>>, vector<13x256xbf16>
    %c0_1 = arith.constant 0 : index
    %c0_2 = arith.constant 0 : index
    %1 = vector.load %arg4[%c0_1, %c0_2] : memref<4x256xbf16, #tpu.memory_space<vmem>>, vector<4x256xbf16>
    %c0_3 = arith.constant 0 : index
    %c0_4 = arith.constant 0 : index
    %2 = vector.load %arg6[%c0_3, %c0_4] : memref<256x256xbf16, #tpu.memory_space<vmem>>, vector<256x256xbf16>
    %c0_5 = arith.constant 0 : index
    %c0_6 = arith.constant 0 : index
    %3 = vector.load %arg8[%c0_5, %c0_6] : memref<256x256xbf16, #tpu.memory_space<vmem>>, vector<256x256xbf16>
    %c0_7 = arith.constant 0 : index
    %c0_8 = arith.constant 0 : index
    %4 = vector.load %arg10[%c0_7, %c0_8] : memref<256x1xbf16, #tpu.memory_space<vmem>>, vector<256x1xbf16>
    %c0_9 = arith.constant 0 : index
    %c0_10 = arith.constant 0 : index
    %5 = vector.load %arg5[%c0_9, %c0_10] : memref<1x256xf32, #tpu.memory_space<vmem>>, vector<1x256xf32>
    %c0_11 = arith.constant 0 : index
    %c0_12 = arith.constant 0 : index
    %6 = vector.load %arg7[%c0_11, %c0_12] : memref<1x256xf32, #tpu.memory_space<vmem>>, vector<1x256xf32>
    %c0_13 = arith.constant 0 : index
    %c0_14 = arith.constant 0 : index
    %7 = vector.load %arg9[%c0_13, %c0_14] : memref<1x256xf32, #tpu.memory_space<vmem>>, vector<1x256xf32>
    %c0_15 = arith.constant 0 : index
    %c0_16 = arith.constant 0 : index
    %8 = memref.load %arg11[%c0_15, %c0_16] : memref<1x1xf32, #tpu.memory_space<smem>>
    %c0_17 = arith.constant 0 : index
    %c0_18 = arith.constant 0 : index
    %9 = vector.load %arg1[%c0_17, %c0_18] : memref<8x13xf32, #tpu.memory_space<vmem>>, vector<8x13xf32>
    %10 = arith.truncf %9 : vector<8x13xf32> to vector<8x13xbf16>
    %c0_19 = arith.constant 0 : index
    %c0_20 = arith.constant 0 : index
    %11 = vector.load %arg2[%c0_19, %c0_20] : memref<8x4xf32, #tpu.memory_space<vmem>>, vector<8x4xf32>
    %12 = arith.truncf %11 : vector<8x4xf32> to vector<8x4xbf16>
    %cst = arith.constant dense<0.000000e+00> : vector<8x256xf32>
    %13 = tpu.matmul %10, %0, %cst {dimension_numbers = #tpu.dot_dimension_numbers<[1], [0], [0], [1], [0, 0, 1, 1], [], []>} : vector<8x13xbf16>, vector<13x256xbf16>, vector<8x256xf32> -> vector<8x256xf32>
    %cst_21 = arith.constant dense<0.000000e+00> : vector<8x256xf32>
    %14 = tpu.matmul %12, %1, %cst_21 {dimension_numbers = #tpu.dot_dimension_numbers<[1], [0], [0], [1], [0, 0, 1, 1], [], []>} : vector<8x4xbf16>, vector<4x256xbf16>, vector<8x256xf32> -> vector<8x256xf32>
    %15 = arith.addf %13, %14 : vector<8x256xf32>
    %16 = vector.broadcast %5 : vector<1x256xf32> to vector<8x256xf32>
    %17 = arith.addf %15, %16 : vector<8x256xf32>
    %cst_22 = arith.constant 0.000000e+00 : f32
    %18 = vector.broadcast %cst_22 : f32 to vector<8x256xf32>
    %19 = arith.maximumf %17, %18 : vector<8x256xf32>
    %20 = arith.truncf %19 : vector<8x256xf32> to vector<8x256xbf16>
    %cst_23 = arith.constant dense<0.000000e+00> : vector<8x256xf32>
    %21 = tpu.matmul %20, %2, %cst_23 {dimension_numbers = #tpu.dot_dimension_numbers<[1], [0], [0], [1], [0, 0, 1, 1], [], []>} : vector<8x256xbf16>, vector<256x256xbf16>, vector<8x256xf32> -> vector<8x256xf32>
    %22 = vector.broadcast %6 : vector<1x256xf32> to vector<8x256xf32>
    %23 = arith.addf %21, %22 : vector<8x256xf32>
    %cst_24 = arith.constant 0.000000e+00 : f32
    %24 = vector.broadcast %cst_24 : f32 to vector<8x256xf32>
    %25 = arith.maximumf %23, %24 : vector<8x256xf32>
    %26 = arith.truncf %25 : vector<8x256xf32> to vector<8x256xbf16>
    %cst_25 = arith.constant dense<0.000000e+00> : vector<8x256xf32>
    %27 = tpu.matmul %26, %3, %cst_25 {dimension_numbers = #tpu.dot_dimension_numbers<[1], [0], [0], [1], [0, 0, 1, 1], [], []>} : vector<8x256xbf16>, vector<256x256xbf16>, vector<8x256xf32> -> vector<8x256xf32>
    %28 = vector.broadcast %7 : vector<1x256xf32> to vector<8x256xf32>
    %29 = arith.addf %27, %28 : vector<8x256xf32>
    %cst_26 = arith.constant 0.000000e+00 : f32
    %30 = vector.broadcast %cst_26 : f32 to vector<8x256xf32>
    %31 = arith.maximumf %29, %30 : vector<8x256xf32>
    %32 = arith.truncf %31 : vector<8x256xf32> to vector<8x256xbf16>
    %cst_27 = arith.constant dense<0.000000e+00> : vector<8x1xf32>
    %33 = tpu.matmul %32, %4, %cst_27 {dimension_numbers = #tpu.dot_dimension_numbers<[1], [0], [0], [1], [0, 0, 1, 1], [], []>} : vector<8x256xbf16>, vector<256x1xbf16>, vector<8x1xf32> -> vector<8x1xf32>
    %34 = vector.broadcast %8 : f32 to vector<8x1xf32>
    %35 = arith.addf %33, %34 : vector<8x1xf32>
    %c0_28 = arith.constant 0 : index
    %c0_29 = arith.constant 0 : index
    %36 = vector.load %arg12[%c0_28, %c0_29] : memref<8x1xf32, #tpu.memory_space<vmem>>, vector<8x1xf32>
    tpu.vector_store %arg12[%c0_28, %c0_29], %35 {strides = array<i32>} : memref<8x1xf32, #tpu.memory_space<vmem>>, vector<8x1xf32>,
    return
  }
  func.func @transform_0(%arg0: i32) -> (i32, i32) {
    %c0_i32 = arith.constant 0 : i32
    %c0_i32_0 = arith.constant 0 : i32
    return %arg0, %c0_i32 : i32, i32
  }
  func.func @transform_1(%arg0: i32) -> (i32, i32) {
    %c0_i32 = arith.constant 0 : i32
    %c0_i32_0 = arith.constant 0 : i32
    return %arg0, %c0_i32 : i32, i32
  }
  func.func @transform_2(%arg0: i32) -> (i32, i32) {
    %c0_i32 = arith.constant 0 : i32
    %c0_i32_0 = arith.constant 0 : i32
    %c0_i32_1 = arith.constant 0 : i32
    return %c0_i32, %c0_i32_0 : i32, i32
  }
  func.func @transform_3(%arg0: i32) -> (i32, i32) {
    %c0_i32 = arith.constant 0 : i32
    %c0_i32_0 = arith.constant 0 : i32
    %c0_i32_1 = arith.constant 0 : i32
    return %c0_i32, %c0_i32_0 : i32, i32
  }
  func.func @transform_4(%arg0: i32) -> (i32, i32) {
    %c0_i32 = arith.constant 0 : i32
    %c0_i32_0 = arith.constant 0 : i32
    %c0_i32_1 = arith.constant 0 : i32
    return %c0_i32, %c0_i32_0 : i32, i32
  }
  func.func @transform_5(%arg0: i32) -> (i32, i32) {
    %c0_i32 = arith.constant 0 : i32
    %c0_i32_0 = arith.constant 0 : i32
    %c0_i32_1 = arith.constant 0 : i32
    return %c0_i32, %c0_i32_0 : i32, i32
  }
  func.func @transform_6(%arg0: i32) -> (i32, i32) {
    %c0_i32 = arith.constant 0 : i32
    %c0_i32_0 = arith.constant 0 : i32
    %c0_i32_1 = arith.constant 0 : i32
    return %c0_i32, %c0_i32_0 : i32, i32
  }
  func.func @transform_7(%arg0: i32) -> (i32, i32) {
    %c0_i32 = arith.constant 0 : i32
    %c0_i32_0 = arith.constant 0 : i32
    %c0_i32_1 = arith.constant 0 : i32
    return %c0_i32, %c0_i32_0 : i32, i32
  }
  func.func @transform_8(%arg0: i32) -> (i32, i32) {
    %c0_i32 = arith.constant 0 : i32
    %c0_i32_0 = arith.constant 0 : i32
    %c0_i32_1 = arith.constant 0 : i32
    return %c0_i32, %c0_i32_0 : i32, i32
  }
  func.func @transform_9(%arg0: i32) -> (i32, i32) {
    %c0_i32 = arith.constant 0 : i32
    %c0_i32_0 = arith.constant 0 : i32
    %c0_i32_1 = arith.constant 0 : i32
    return %c0_i32, %c0_i32_0 : i32, i32
  }
  func.func @transform_10(%arg0: i32) -> (i32, i32) {
    %c0_i32 = arith.constant 0 : i32
    %c0_i32_0 = arith.constant 0 : i32
    %c0_i32_1 = arith.constant 0 : i32
    return %c0_i32, %c0_i32_0 : i32, i32
  }
  func.func @transform_11(%arg0: i32) -> (i32, i32) {
    %c0_i32 = arith.constant 0 : i32
    %c0_i32_0 = arith.constant 0 : i32
    return %arg0, %c0_i32 : i32, i32
  }
}

</mosaic_0001>

<bundles_post_ra>
// kernel: critic_forward.1
= control target key start
LH: loop header
LB: loop body
LE: loop exit
PB: predicated region body
PF: predicated region fallthrough
CT: control target
= control target key end

     0   :  { %17 = vsyncpa [#allocation4], 0  ;;  %s1348_s0 = inlined_call_operand.vmem [shape: f32[2,13], index: 0, kind: input, shape index: {}]   ;;  %s1349_s1 = inlined_call_operand.vmem [shape: f32[2,4], index: 1, kind: input, shape index: {}]   ;;  %s1350_s2 = inlined_call_operand.vmem [shape: bf16[13,256], index: 2, kind: input, shape index: {}]   ;;  %s1351_s3 = inlined_call_operand.vmem [shape: bf16[4,256], index: 3, kind: input, shape index: {}]   ;;  %s1352_s4 = inlined_call_operand.vmem [shape: f32[1,256], index: 4, kind: input, shape index: {}]   ;;  %s1353_s5 = inlined_call_operand.hbm [shape: bf16[256,256], index: 5, kind: input, shape index: {}]   ;;  %s1354_s6 = inlined_call_operand.vmem [shape: f32[1,256], index: 6, kind: input, shape index: {}]   ;;  %s1355_s7 = inlined_call_operand.hbm [shape: bf16[256,256], index: 7, kind: input, shape index: {}]   ;;  %s1356_s8 = inlined_call_operand.vmem [shape: f32[1,256], index: 8, kind: input, shape index: {}]   ;;  %s1357_s9 = inlined_call_operand.vmem [shape: bf16[256,1], index: 9, kind: input, shape index: {}]   ;;  %s1358_s10 = inlined_call_operand.<no memory space> [shape: f32[1,1], index: 10, kind: input, shape index: {}]   ;;  %s1359_s11 = inlined_call_operand.vmem [shape: f32[8,1], index: 11, kind: output, shape index: {}]  }
   0x1   :  { %18 = vsyncpa [#allocation6], 0  ;;  %s1170_s17 = smov [#allocation3]   ;;  %s1122_s21 = scalar_lea.hbm %s1353_s5, 4096 }
   0x2   :  { %s34_s18 = sshll.u32 %s1170_s17, 4  ;;  %p1123_p0 = scmp.ne.s32.totalorder %s1353_s5, %s1122_s21  ;;  %s35_s18 = int_to_ptr.vmem [resolvable:$true] %s34_s18 }
   0x3   :  { %p1126_p1 = scmp.lt.u32.totalorder %s1122_s21, %s1353_s5 }
   0x5   :  { %p1128_p2 = pnand %p1126_p1, %p1123_p0 }
   0x7   :  { %1131 = shalt.err (!%p1128_p2)
}
   0x8   :  { %s1132_s26 = scalar_lea.vmem %s35_s18, 4096  ;;  %p1137_p4 = scmp.lt.s32.totalorder %s35_s18, %s35_s18 }
   0x9   :  { %p1133_p3 = scmp.ne.s32.totalorder %s35_s18, %s1132_s26  ;;  %p1138_p5 = scmp.lt.s32.totalorder %s1132_s26, %s1132_s26 }
   0xb   :  { %p1139_p6 = por %p1138_p5, %p1137_p4 }
   0xd   :  { %p1140_p7 = pnand %p1139_p6, %p1133_p3 }
   0xf   :  { %1143 = shalt.err (!%p1140_p7)
}
  0x10   :  { %s1171_s27 = smov 128   ;;  %s1172_s28 = smov 8  }
  0x11   :  { %40 = dma.hbm_to_vmem [thread:$0]  %s1353_s5, 4096, %s35_s18, [#allocation4], %s1171_s27, %s1171_s27, %s1172_s28  }
  0x12   :  { %s1173_s12 = smov [#allocation5]   ;;  %s1144_s16 = scalar_lea.hbm %s1355_s7, 4096 }
  0x13   :  { %s48_s13 = sshll.u32 %s1173_s12, 4  ;;  %p1145_p8 = scmp.ne.s32.totalorder %s1355_s7, %s1144_s16  ;;  %s49_s13 = int_to_ptr.vmem [resolvable:$true] %s48_s13 }
  0x14   :  { %p1148_p9 = scmp.lt.u32.totalorder %s1144_s16, %s1355_s7 }
  0x16   :  { %p1150_p10 = pnand %p1148_p9, %p1145_p8 }
  0x18   :  { %1153 = shalt.err (!%p1150_p10)
}
  0x19   :  { %s1154_s22 = scalar_lea.vmem %s49_s13, 4096  ;;  %p1159_p12 = scmp.lt.s32.totalorder %s49_s13, %s49_s13 }
  0x1a   :  { %p1155_p11 = scmp.ne.s32.totalorder %s49_s13, %s1154_s22  ;;  %p1160_p13 = scmp.lt.s32.totalorder %s1154_s22, %s1154_s22 }
  0x1c   :  { %p1161_p0 = por %p1160_p13, %p1159_p12 }
  0x1e   :  { %p1162_p1 = pnand %p1161_p0, %p1155_p11 }
  0x20   :  { %1165 = shalt.err (!%p1162_p1)
}
  0x21   :  { %54 = dma.hbm_to_vmem [thread:$0]  %s1355_s7, 4096, %s49_s13, [#allocation6], %s1171_s27, %s1171_s27, %s1172_s28  }
  0x22   :  { %1166 = dma.done.wait [#allocation4], 4096  }
  0x23   :  { %1167 = vsyncadd [#allocation4], 4294963200 }
  0x24   :  { %1168 = dma.done.wait [#allocation6], 4096  }
  0x25   :  { %1169 = vsyncadd [#allocation6], 4294963200  ;;  %vm248_vm0 = vcmask 1045504   ;;  %v1174_v0 = vmov 0   ;;  %vm249_vm1 = vcmask 1046528   ;;  %v1175_v1 = vmov 65535  }
  0x26   :  { %227 = vmatprep.mubr.bf16.mxu1 %v1174_v0  ;;  %v250_v2 = vsel %vm248_vm0, 4294967295, %v1175_v1  ;;  %vm188_vm2 = vcmask 1041408   ;;  %v893_v4 = vld.sshfl [vmem:[%s1351_s3] sm:$0x33 pattern:$0x76325410] }
  0x27   :  { %v251_v3 = vsel %vm249_vm1, %v250_v2, 0  ;;  %v173_v5 = vld [vmem:[%s1349_s1] sm:$0xff]  ;;  %v183_v6 = vcombine.high %v893_v4, %v893_v4  ;;  %v190_v7 = vsel %vm188_vm2, %v893_v4, 0  ;;  %vm184_vm3 = vcmask 31744   ;;  %v1013_v15 = vld [vmem:[#allocation3 + $0x14] ss:$8 sps:$4 sm:$0xff]  }
  0x28   :  { %v1007_v8 = vld [vmem:[%s1350_s2] ss:$8 sps:$4 sm:$0x7f]   ;;  %v1009_v9 = vld [vmem:[%s1350_s2 + $0x4] ss:$8 sps:$4 sm:$0x7f]   ;;  %v174_v10 = vpack.c.bf16 %v173_v5, %v173_v5 }
  0x29   :  { %894 = vmatprep.subr.msk.bf16.mxu1 %vm188_vm2, %v183_v6  ;;  %v1010_v11 = vld [vmem:[#allocation3 + $0x4] ss:$8 sps:$4 sm:$0xff]   ;;  %v1012_v12 = vld [vmem:[#allocation3] ss:$8 sps:$4 sm:$0xff]   ;;  %v253_v13 = vand.u32 %v1007_v8, %v251_v3  ;;  %v256_v14 = vand.u32 %v1009_v9, %v251_v3  ;;  %v1015_v16 = vld [vmem:[#allocation3 + $0x10] ss:$8 sps:$4 sm:$0xff]  }
  0x2a   :  { %196 = vmatpush1.bf16.msra.mxu1 %v190_v7  ;;  %487 = vmatprep.subr.bf16.mxu0 %v1010_v11  ;;  %v1016_v17 = vld [vmem:[#allocation3 + $0x24] ss:$8 sps:$4 sm:$0xff]   ;;  %v1018_v19 = vld [vmem:[#allocation3 + $0x20] ss:$8 sps:$4 sm:$0xff]   ;;  %v1019_v21 = vld [vmem:[#allocation3 + $0x34] ss:$8 sps:$4 sm:$0xff]   ;;  %v300_v11 = vlaneseq }
  0x2b   :  { %258 = vmatprep.subr.bf16.mxu1 %v256_v14  ;;  %488 = vmatpush1.bf16.msra.mxu0 %v1012_v12  ;;  %v171_v18 = vld [vmem:[%s1348_s0] sm:$0xff]  ;;  %vm244_vm4 = vcmask 105472   ;;  %v1021_v22 = vld [vmem:[#allocation3 + $0x30] ss:$8 sps:$4 sm:$0xff]   ;;  %v1025_v25 = vld [vmem:[#allocation3 + $0x54] ss:$8 sps:$4 sm:$0xff]  }
  0x2c   :  { %489 = vmatprep.subr.bf16.mxu0 %v1013_v15  ;;  %v172_v20 = vpack.c.bf16 %v171_v18, %v171_v18  ;;  %v1022_v23 = vld [vmem:[#allocation3 + $0x44] ss:$8 sps:$4 sm:$0xff]   ;;  %v1024_v24 = vld [vmem:[#allocation3 + $0x40] ss:$8 sps:$4 sm:$0xff]   ;;  %v1027_v26 = vld [vmem:[#allocation3 + $0x50] ss:$8 sps:$4 sm:$0xff]  }
  0x2d   :  { %895 = vmatmul.mubr.msk.bf16.vlgmr.msra.gmra.mrb[0].mxu1 %vm184_vm3, %v174_v10  ;;  %v1028_v27 = vld [vmem:[#allocation3 + $0x64] ss:$8 sps:$4 sm:$0xff]   ;;  %v1030_v28 = vld [vmem:[#allocation3 + $0x60] ss:$8 sps:$4 sm:$0xff]   ;;  %v1031_v29 = vld [vmem:[#allocation3 + $0x74] ss:$8 sps:$4 sm:$0xff]  }
  0x2e   :  { %259 = vmatpush1.bf16.msra.mxu1 %v253_v13  ;;  %290 = vmatprep.mubr.bf16.mxu1 %v1174_v0  ;;  %v1033_v30 = vld [vmem:[#allocation3 + $0x70] ss:$8 sps:$4 sm:$0xff]   ;;  %v1034_v31 = vld [vmem:[#allocation3 + $0x84] ss:$8 sps:$4 sm:$0xff]   ;;  %v1036_v32 = vld [vmem:[#allocation3 + $0x80] ss:$8 sps:$4 sm:$0xff]  }
  0x2f   :  { %490 = vmatpush1.bf16.msra.mxu0 %v1015_v16  ;;  %v1037_v33 = vld [vmem:[#allocation3 + $0x94] ss:$8 sps:$4 sm:$0xff]   ;;  %v1039_v34 = vld [vmem:[#allocation3 + $0x90] ss:$8 sps:$4 sm:$0xff]   ;;  %v1040_v35 = vld [vmem:[#allocation3 + $0xa4] ss:$8 sps:$4 sm:$0xff]  }
  0x30   :  { %491 = vmatprep.subr.bf16.mxu0 %v1016_v17  ;;  %v1042_v36 = vld [vmem:[#allocation3 + $0xa0] ss:$8 sps:$4 sm:$0xff]   ;;  %v1043_v37 = vld [vmem:[#allocation3 + $0xb4] ss:$8 sps:$4 sm:$0xff]   ;;  %v1045_v38 = vld [vmem:[#allocation3 + $0xb0] ss:$8 sps:$4 sm:$0xff]  }
  0x31   :  { %v1046_v39 = vld [vmem:[#allocation3 + $0xc4] ss:$8 sps:$4 sm:$0xff]   ;;  %v1048_v40 = vld [vmem:[#allocation3 + $0xc0] ss:$8 sps:$4 sm:$0xff]   ;;  %v1049_v41 = vld [vmem:[#allocation3 + $0xd4] ss:$8 sps:$4 sm:$0xff]  }
  0x32   :  { %v1051_v42 = vld [vmem:[#allocation3 + $0xd0] ss:$8 sps:$4 sm:$0xff]   ;;  %v1052_v43 = vld [vmem:[#allocation3 + $0xe4] ss:$8 sps:$4 sm:$0xff]   ;;  %v1054_v44 = vld [vmem:[#allocation3 + $0xe0] ss:$8 sps:$4 sm:$0xff]  }
  0x33   :  { %492 = vmatpush1.bf16.msra.mxu0 %v1018_v19  ;;  %v1055_v45 = vld [vmem:[#allocation3 + $0xf4] ss:$8 sps:$4 sm:$0xff]   ;;  %v1057_v46 = vld [vmem:[#allocation3 + $0xf0] ss:$8 sps:$4 sm:$0xff]   ;;  %v1058_v47 = vld [vmem:[#allocation5] ss:$8 sps:$4 sm:$0xff]  }
  0x34   :  { %493 = vmatprep.subr.bf16.mxu0 %v1019_v21  ;;  %v1060_v48 = vld [vmem:[#allocation5 + $0x4] ss:$8 sps:$4 sm:$0xff]   ;;  %v1063_v49 = vld [vmem:[#allocation5 + $0x14] ss:$8 sps:$4 sm:$0xff]   ;;  %v1061_v50 = vld [vmem:[#allocation5 + $0x10] ss:$8 sps:$4 sm:$0xff]  }
  0x35   :  { %898 = vmatmul.mubr.msk.bf16.vlgmr.msra.gmra.mrb[4].mxu1 %vm244_vm4, %v172_v20  ;;  %703 = vmatprep.subr.bf16.mxu1 %v1060_v48  ;;  %v1066_v51 = vld [vmem:[#allocation5 + $0x24] ss:$8 sps:$4 sm:$0xff]   ;;  %v1064_v52 = vld [vmem:[#allocation5 + $0x20] ss:$8 sps:$4 sm:$0xff]   ;;  %v1069_v53 = vld [vmem:[#allocation5 + $0x34] ss:$8 sps:$4 sm:$0xff]  }
  0x36   :  { %704 = vmatpush1.bf16.msra.mxu1 %v1058_v47  ;;  %v1067_v54 = vld [vmem:[#allocation5 + $0x30] ss:$8 sps:$4 sm:$0xff]   ;;  %v1072_v55 = vld [vmem:[#allocation5 + $0x44] ss:$8 sps:$4 sm:$0xff]   ;;  %v1070_v56 = vld [vmem:[#allocation5 + $0x40] ss:$8 sps:$4 sm:$0xff]  }
  0x37   :  { %494 = vmatpush1.bf16.msra.mxu0 %v1021_v22  ;;  %705 = vmatprep.subr.bf16.mxu1 %v1063_v49  ;;  %v1075_v57 = vld [vmem:[#allocation5 + $0x54] ss:$8 sps:$4 sm:$0xff]   ;;  %v1073_v58 = vld [vmem:[#allocation5 + $0x50] ss:$8 sps:$4 sm:$0xff]   ;;  %v1078_v59 = vld [vmem:[#allocation5 + $0x64] ss:$8 sps:$4 sm:$0xff]  }
  0x38   :  { %495 = vmatprep.subr.bf16.mxu0 %v1022_v23  ;;  %v1076_v60 = vld [vmem:[#allocation5 + $0x60] ss:$8 sps:$4 sm:$0xff]   ;;  %v1081_v61 = vld [vmem:[#allocation5 + $0x74] ss:$8 sps:$4 sm:$0xff]   ;;  %v1079_v62 = vld [vmem:[#allocation5 + $0x70] ss:$8 sps:$4 sm:$0xff]  }
  0x39   :  { %v1084_v63 = vld [vmem:[#allocation5 + $0x84] ss:$8 sps:$4 sm:$0xff]   ;;  %v1082_v0 = vld [vmem:[#allocation5 + $0x80] ss:$8 sps:$4 sm:$0xff]   ;;  %v1087_v1 = vld [vmem:[#allocation5 + $0x94] ss:$8 sps:$4 sm:$0xff]  }
  0x3a   :  { %706 = vmatpush1.bf16.msra.mxu1 %v1061_v50  ;;  %v1085_v2 = vld [vmem:[#allocation5 + $0x90] ss:$8 sps:$4 sm:$0xff]   ;;  %v1090_v3 = vld [vmem:[#allocation5 + $0xa4] ss:$8 sps:$4 sm:$0xff]   ;;  %v1088_v4 = vld [vmem:[#allocation5 + $0xa0] ss:$8 sps:$4 sm:$0xff]  }
  0x3b   :  { %496 = vmatpush1.bf16.msra.mxu0 %v1024_v24  ;;  %707 = vmatprep.subr.bf16.mxu1 %v1066_v51  ;;  %v1093_v5 = vld [vmem:[#allocation5 + $0xb4] ss:$8 sps:$4 sm:$0xff]   ;;  %v1091_v6 = vld [vmem:[#allocation5 + $0xb0] ss:$8 sps:$4 sm:$0xff]   ;;  %v1096_v7 = vld [vmem:[#allocation5 + $0xc4] ss:$8 sps:$4 sm:$0xff]  }
  0x3c   :  { %497 = vmatprep.subr.bf16.mxu0 %v1025_v25  ;;  %v1094_v8 = vld [vmem:[#allocation5 + $0xc0] ss:$8 sps:$4 sm:$0xff]   ;;  %v1099_v9 = vld [vmem:[#allocation5 + $0xd4] ss:$8 sps:$4 sm:$0xff]   ;;  %v1097_v10 = vld [vmem:[#allocation5 + $0xd0] ss:$8 sps:$4 sm:$0xff]  }
  0x3d   :  { %v301_v12 = vshrl.u32 %v300_v11, 7  ;;  %v167_v18 = vld [vmem:[%s1352_s4] sm:$0x3]  ;;  %v1116_v48 = vld [vmem:[%s1357_s9 + $0x68] sm:$0xff]   ;;  %vm885_vm5 = vcmask 7168  }
  0x3e   :  { %708 = vmatpush1.bf16.msra.mxu1 %v1064_v52  ;;  %v1115_v47 = vld [vmem:[%s1357_s9 + $0x20] sm:$0xff]   ;;  %v1117_v49 = vld [vmem:[%s1357_s9 + $0x28] sm:$0xff]  }
  0x3f   :  { %498 = vmatpush1.bf16.msra.mxu0 %v1027_v26  ;;  %709 = vmatprep.subr.bf16.mxu1 %v1069_v53  ;;  %v1275_v17 = vsub.s32 0, %v301_v12  ;;  %v1280_v19 = vsub.s32 1, %v301_v12  ;;  %v168_v50 = vld [vmem:[%s1354_s6] sm:$0x3] }
  0x40   :  { %499 = vmatprep.subr.bf16.mxu0 %v1028_v27 }
  0x41   :  { %v303_v20 = vrot.slane %v167_v18, %v1275_v17  ;;  %v307_v22 = vrot.slane %v167_v18, %v1280_v19  ;;  %v320_v51 = vrot.slane %v168_v50, %v1275_v17  ;;  %v324_v52 = vrot.slane %v168_v50, %v1280_v19 }
  0x42   :  { %710 = vmatpush1.bf16.msra.mxu1 %v1067_v54  ;;  %v748_v18 = vstv %s1358_s10 }
  0x43   :  { %500 = vmatpush1.bf16.msra.mxu0 %v1030_v28  ;;  %711 = vmatprep.subr.bf16.mxu1 %v1072_v55 }
  0x44   :  { %501 = vmatprep.subr.bf16.mxu0 %v1031_v29 }
  0x46   :  { %712 = vmatpush1.bf16.msra.mxu1 %v1070_v56 }
  0x47   :  { %502 = vmatpush1.bf16.msra.mxu0 %v1033_v30  ;;  %713 = vmatprep.subr.bf16.mxu1 %v1075_v57 }
  0x48   :  { %503 = vmatprep.subr.bf16.mxu0 %v1034_v31 }
  0x4a   :  { %714 = vmatpush1.bf16.msra.mxu1 %v1073_v58 }
  0x4b   :  { %504 = vmatpush1.bf16.msra.mxu0 %v1036_v32  ;;  %715 = vmatprep.subr.bf16.mxu1 %v1078_v59 }
  0x4c   :  { %505 = vmatprep.subr.bf16.mxu0 %v1037_v33 }
  0x4e   :  { %716 = vmatpush1.bf16.msra.mxu1 %v1076_v60 }
  0x4f   :  { %506 = vmatpush1.bf16.msra.mxu0 %v1039_v34  ;;  %717 = vmatprep.subr.bf16.mxu1 %v1081_v61  ;;  %v1102_v34 = vld [vmem:[#allocation5 + $0xe4] ss:$8 sps:$4 sm:$0xff]  }
  0x50   :  { %507 = vmatprep.subr.bf16.mxu0 %v1040_v35  ;;  %v1100_v35 = vld [vmem:[#allocation5 + $0xe0] ss:$8 sps:$4 sm:$0xff]  }
  0x52   :  { %718 = vmatpush1.bf16.msra.mxu1 %v1079_v62 }
  0x53   :  { %508 = vmatpush1.bf16.msra.mxu0 %v1042_v36  ;;  %719 = vmatprep.subr.bf16.mxu1 %v1084_v63  ;;  %v1105_v36 = vld [vmem:[#allocation5 + $0xf4] ss:$8 sps:$4 sm:$0xff]  }
  0x54   :  { %509 = vmatprep.subr.bf16.mxu0 %v1043_v37  ;;  %v1103_v37 = vld [vmem:[#allocation5 + $0xf0] ss:$8 sps:$4 sm:$0xff]  }
  0x55   :  { %v1118_v63 = vld [vmem:[%s1357_s9 + $0x70] sm:$0xff]  }
  0x56   :  { %720 = vmatpush1.bf16.msra.mxu1 %v1082_v0  ;;  %v1119_v0 = vld [vmem:[%s1357_s9 + $0x30] sm:$0xff]  }
  0x57   :  { %510 = vmatpush1.bf16.msra.mxu0 %v1045_v38  ;;  %721 = vmatprep.subr.bf16.mxu1 %v1087_v1  ;;  %v1106_v38 = vld [vmem:[%s1357_s9 + $0x40] sm:$0xff]   ;;  %v1120_v1 = vld [vmem:[%s1357_s9 + $0x78] sm:$0xff]  }
  0x58   :  { %511 = vmatprep.subr.bf16.mxu0 %v1046_v39  ;;  %v1107_v39 = vld [vmem:[%s1357_s9] sm:$0xff]  }
  0x5a   :  { %722 = vmatpush1.bf16.msra.mxu1 %v1085_v2  ;;  %v1121_v2 = vld [vmem:[%s1357_s9 + $0x38] sm:$0xff]  }
  0x5b   :  { %512 = vmatpush1.bf16.msra.mxu0 %v1048_v40  ;;  %723 = vmatprep.subr.bf16.mxu1 %v1090_v3  ;;  %v1108_v40 = vld [vmem:[%s1357_s9 + $0x48] sm:$0xff]   ;;  %v169_v3 = vld [vmem:[%s1356_s8] sm:$0x3] }
  0x5c   :  { %513 = vmatprep.subr.bf16.mxu0 %v1049_v41  ;;  %v1109_v41 = vld [vmem:[%s1357_s9 + $0x8] sm:$0xff]  }
  0x5e   :  { %724 = vmatpush1.bf16.msra.mxu1 %v1088_v4  ;;  %v536_v4 = vrot.slane %v169_v3, %v1275_v17 }
  0x5f   :  { %514 = vmatpush1.bf16.msra.mxu0 %v1051_v42  ;;  %725 = vmatprep.subr.bf16.mxu1 %v1093_v5  ;;  %v1110_v42 = vld [vmem:[%s1357_s9 + $0x50] sm:$0xff]   ;;  %v540_v5 = vrot.slane %v169_v3, %v1280_v19 }
  0x60   :  { %515 = vmatprep.subr.bf16.mxu0 %v1052_v43  ;;  %v1111_v43 = vld [vmem:[%s1357_s9 + $0x10] sm:$0xff]  }
  0x62   :  { %726 = vmatpush1.bf16.msra.mxu1 %v1091_v6 }
  0x63   :  { %516 = vmatpush1.bf16.msra.mxu0 %v1054_v44  ;;  %727 = vmatprep.subr.bf16.mxu1 %v1096_v7  ;;  %v1112_v44 = vld [vmem:[%s1357_s9 + $0x58] sm:$0xff]  }
  0x64   :  { %517 = vmatprep.subr.bf16.mxu0 %v1055_v45  ;;  %v1113_v45 = vld [vmem:[%s1357_s9 + $0x18] sm:$0xff]  }
  0x66   :  { %728 = vmatpush1.bf16.msra.mxu1 %v1094_v8 }
  0x67   :  { %518 = vmatpush1.bf16.msra.mxu0 %v1057_v46  ;;  %729 = vmatprep.subr.bf16.mxu1 %v1099_v9  ;;  %v1114_v46 = vld [vmem:[%s1357_s9 + $0x60] sm:$0xff]  }
  0x68   :  { %979 = vmatprep.subr.bf16.mxu0 %v1106_v38 }
  0x6a   :  { %730 = vmatpush1.bf16.msra.mxu1 %v1097_v10 }
  0x6b   :  { %731 = vmatprep.subr.bf16.mxu1 %v1102_v34 }
  0x6e   :  { %732 = vmatpush1.bf16.msra.mxu1 %v1100_v35 }
  0x6f   :  { %733 = vmatprep.subr.bf16.mxu1 %v1105_v36 }
  0x72   :  { %734 = vmatpush1.bf16.msra.mxu1 %v1103_v37 }
 0x100   :  { %v229_v13 = vpop.f32.mrb[0].mxu1 }
 0x101   :  { %v231_v14 = vpop.f32.mrb[1].mxu1 }
 0x102   :  { %v233_v15 = vpop.f32.mrb[2].mxu1 }
 0x103   :  { %v234_v16 = vpop.f32.mrb[3].mxu1 }
 0x108   :  { %v292_v21 = vpop.f32.mrb[4].mxu1 }
 0x109   :  { %v293_v23 = vadd.f32 %v292_v21, %v229_v13  ;;  %v294_v24 = vpop.f32.mrb[5].mxu1 }
 0x10a   :  { %v295_v25 = vadd.f32 %v294_v24, %v231_v14  ;;  %v296_v26 = vpop.f32.mrb[6].mxu1 }
 0x10b   :  { %v310_v27 = vadd.f32 %v303_v20, %v293_v23  ;;  %v297_v28 = vpop.f32.mrb[7].mxu1 }
 0x10c   :  { %v311_v29 = vadd.f32 %v307_v22, %v295_v25 }
 0x10d   :  { %v312_v30 = vmax.f32 %v310_v27, 0.0 }
 0x10e   :  { %v313_v31 = vmax.f32 %v311_v29, 0.0 }
 0x10f   :  { %v314_v33 = vpack.c.bf16 %v312_v30, %v312_v30 }
 0x110   :  { %v315_v32 = vpack.c.bf16 %v313_v31, %v313_v31 }
 0x112   :  { %519 = vmatprep.mubr.bf16.mxu0 %v315_v32 }
 0x113   :  { %520 = vmatmul.mubr.bf16.vlgmr.msra.gmra.mrb[0].mxu0 %v314_v33 }
 0x114   :  { %980 = vmatpush3.bf16.msra.mxu0 %v1107_v39 }
 0x115   :  { %981 = vmatprep.subr.bf16.mxu0 %v1108_v40 }
 0x118   :  { %982 = vmatpush3.bf16.msra.mxu0 %v1109_v41 }
 0x119   :  { %983 = vmatprep.subr.bf16.mxu0 %v1110_v42 }
 0x11c   :  { %984 = vmatpush3.bf16.msra.mxu0 %v1111_v43 }
 0x11d   :  { %985 = vmatprep.subr.bf16.mxu0 %v1112_v44 }
 0x120   :  { %986 = vmatpush3.bf16.msra.mxu0 %v1113_v45 }
 0x121   :  { %987 = vmatprep.subr.bf16.mxu0 %v1114_v46 }
 0x124   :  { %988 = vmatpush3.bf16.msra.mxu0 %v1115_v47 }
 0x125   :  { %989 = vmatprep.subr.bf16.mxu0 %v1116_v48 }
 0x128   :  { %990 = vmatpush3.bf16.msra.mxu0 %v1117_v49 }
 0x129   :  { %991 = vmatprep.subr.bf16.mxu0 %v1118_v63 }
 0x12c   :  { %992 = vmatpush3.bf16.msra.mxu0 %v1119_v0 }
 0x12d   :  { %993 = vmatprep.subr.bf16.mxu0 %v1120_v1 }
 0x130   :  { %994 = vmatpush3.bf16.msra.mxu0 %v1121_v2 }
 0x1e6   :  { %v521_v53 = vpop.f32.mrb[0].mxu0 }
 0x1e7   :  { %v522_v54 = vadd.f32 %v521_v53, %v320_v51  ;;  %v523_v55 = vpop.f32.mrb[1].mxu0 }
 0x1e8   :  { %v524_v56 = vadd.f32 %v523_v55, %v324_v52  ;;  %v525_v57 = vpop.f32.mrb[2].mxu0 }
 0x1e9   :  { %v528_v58 = vmax.f32 %v522_v54, 0.0  ;;  %v526_v59 = vpop.f32.mrb[3].mxu0 }
 0x1ea   :  { %v529_v60 = vmax.f32 %v524_v56, 0.0 }
 0x1eb   :  { %v530_v62 = vpack.c.bf16 %v528_v58, %v528_v58 }
 0x1ec   :  { %v531_v61 = vpack.c.bf16 %v529_v60, %v529_v60 }
 0x1ee   :  { %735 = vmatprep.mubr.bf16.mxu1 %v531_v61 }
 0x1ef   :  { %736 = vmatmul.mubr.bf16.vlgmr.msra.gmra.mrb[8].mxu1 %v530_v62 }
 0x2c2   :  { %v737_v6 = vpop.f32.mrb[8].mxu1 }
 0x2c3   :  { %v738_v7 = vadd.f32 %v737_v6, %v536_v4  ;;  %v739_v8 = vpop.f32.mrb[9].mxu1 }
 0x2c4   :  { %v740_v9 = vadd.f32 %v739_v8, %v540_v5  ;;  %v741_v10 = vpop.f32.mrb[10].mxu1 }
 0x2c5   :  { %v744_v11 = vmax.f32 %v738_v7, 0.0  ;;  %v742_v12 = vpop.f32.mrb[11].mxu1 }
 0x2c6   :  { %v745_v13 = vmax.f32 %v740_v9, 0.0 }
 0x2c7   :  { %v746_v15 = vpack.c.bf16 %v744_v11, %v744_v11 }
 0x2c8   :  { %v747_v14 = vpack.c.bf16 %v745_v13, %v745_v13 }
 0x2ca   :  { %877 = vmatprep.mubr.bf16.mxu0 %v747_v14 }
 0x2cb   :  { %878 = vmatmul.mubr.bf16.vlgmr.msra.gmra.mrb[4].mxu0 %v746_v15 }
 0x39e   :  { %v995_v16 = vpop.f32.mrb[4].mxu0 }
 0x39f   :  { %v996_v17 = vpop.f32.mrb[5].mxu0 }
 0x3a0   :  { %v997_v20 = vadd.f32 %v996_v17, %v995_v16  ;;  %v998_v19 = vpop.f32.mrb[6].mxu0 }
 0x3a1   :  { %v999_v21 = vpop.f32.mrb[7].mxu0 }
 0x3a2   :  { %v880_v22 = vadd.f32 %v997_v20, %v748_v18 }
 0x3a4   :  { %886 = vst.msk [vmem:[%s1359_s11] sm:$0xff] %vm885_vm5, %v880_v22 }
 0x3a5   :  { %891 = vsyncpa [#allocation4], 1 }
 0x3a6   :  { %892 = vsyncpa [#allocation6], 1 }

</bundles_post_ra>
